<compile_context>
chip_gen: v6e
topology: v6e:2x2x1
jax: 0.10.0
libtpu: 0.0.40
codegen_flags: <defaults>
</compile_context>

<pallas_src>
import jax
import jax.numpy as jnp
from jax.experimental import pallas as pl
from jax.experimental.pallas import tpu as pltpu


# ----------------------------- model dims (small) ---------------------------
B = 2          # batch
C = 4          # input channels
H = W = 16     # spatial
PS = 8         # patch size        -> S = (H//PS)*(W//PS) = 4 "tokens"
S = (H // PS) * (W // PS)
P = C * PS * PS                      # flattened patch dim = 256
CHW = C * H * W                      # flattened image dim = 1024
D = 32                               # feature_dim (hidden_size, scaled down)
F1 = 128                             # bottleneck width   (4096 in original)
F2 = 64                              # classifier hidden  (2048 in original)
F3 = 32                              # classifier hidden  (1024 in original)
NC = 16                              # num_classes        (500 in original)
BN_EPS = 1e-5

LP = 128                             # lane-dense padded width for classifier


# --------------------------------- kernel -----------------------------------
def net_head_kernel(x_ref, w_eff_ref, w_pack_ref, b_pack_ref, out_ref):
    # x_ref:      (B, CHW)    f32   flattened images (patchify+mean folded into w_eff)
    # w_eff_ref:  (CHW, F1)   bf16  patchify-perm + mean + patch-embed + bottleneck + BN
    # w_pack_ref: (3, LP, LP) bf16  classifier weights w2/w3/w4, zero-padded to 128x128
    # b_pack_ref: (4, LP)     f32   biases: [bottleneck(BN-folded), b2, b3, b4], padded
    # out_ref:    (B, LP)     f32   lane-dense output; valid region is [:, :NC]
    x = x_ref[...].astype(jnp.bfloat16)
    b = b_pack_ref[...]

    # fused: patchify + mean + patch-embed + bottleneck Linear + BN(eval) + ReLU
    h1 = jnp.maximum(
        jnp.dot(x, w_eff_ref[...], preferred_element_type=jnp.float32) + b[0:1, :],
        0.0)
    # classifier Linear -> ReLU -> Linear -> ReLU -> Linear (Dropout = identity)
    h2 = jnp.maximum(
        jnp.dot(h1.astype(jnp.bfloat16), w_pack_ref[0],
                preferred_element_type=jnp.float32) + b[1:2, :],
        0.0)
    h3 = jnp.maximum(
        jnp.dot(h2.astype(jnp.bfloat16), w_pack_ref[1],
                preferred_element_type=jnp.float32) + b[2:3, :],
        0.0)
    out_ref[...] = (
        jnp.dot(h3.astype(jnp.bfloat16), w_pack_ref[2],
                preferred_element_type=jnp.float32) + b[3:4, :])


_COST = pl.CostEstimate(
    flops=2 * (B * CHW * F1 + 3 * B * LP * LP),
    transcendentals=0,
    bytes_accessed=(4 * B * CHW            # x (f32)
                    + 2 * CHW * F1          # w_eff (bf16)
                    + 2 * 3 * LP * LP       # w_pack (bf16)
                    + 4 * 4 * LP            # b_pack (f32)
                    + 4 * B * LP),          # out (f32)
)


# --------------------------------- wrapper ----------------------------------
@jax.jit
def net_forward(x, fused):
    """x: (B, C, H, W) float32 (NCHW, like the PyTorch module)."""
    # Free row-major flatten -- all permutation/mean glue lives inside w_eff.
    x_flat = x.reshape(B, CHW)

    vmem = pl.BlockSpec(memory_space=pltpu.MemorySpace.VMEM)
    out = pl.pallas_call(
        net_head_kernel,
        out_shape=jax.ShapeDtypeStruct((B, LP), jnp.float32),
        in_specs=[vmem, vmem, vmem, vmem],
        out_specs=vmem,
        cost_estimate=_COST,
        compiler_params=pltpu.CompilerParams(vmem_limit_bytes=4 * 1024 * 1024),
    )(x_flat, fused["w_eff"], fused["w_pack"], fused["b_pack"])
    return out[:, :NC]


# ------------------------------ parameter prep -------------------------------
def init_params(key):
    def linear(key, fan_in, fan_out):
        kw, kb = jax.random.split(key)
        bound = 1.0 / jnp.sqrt(fan_in)
        w = jax.random.uniform(kw, (fan_in, fan_out), jnp.float32, -bound, bound)
        b = jax.random.uniform(kb, (1, fan_out), jnp.float32, -bound, bound)
        return w, b

    k = jax.random.split(key, 5)
    wp, bp = linear(k[0], P, D)
    w1, b1 = linear(k[1], D, F1)
    w2, b2 = linear(k[2], F1, F2)
    w3, b3 = linear(k[3], F2, F3)
    w4, b4 = linear(k[4], F3, NC)
    return {
        "wp": wp, "bp": bp,
        "w1": w1, "b1": b1,
        # BatchNorm1d defaults: gamma=1, beta=0, running_mean=0, running_var=1
        "bn_g": jnp.ones((1, F1), jnp.float32),
        "bn_b": jnp.zeros((1, F1), jnp.float32),
        "bn_mu": jnp.zeros((1, F1), jnp.float32),
        "bn_var": jnp.ones((1, F1), jnp.float32),
        "w2": w2, "b2": b2,
        "w3": w3, "b3": b3,
        "w4": w4, "b4": b4,
    }


def fuse_params(p):
    """Host-side, one-time algebraic folding (no nonlinearity between the ops)."""
    # patch-embed then bottleneck Linear collapse exactly:
    #   mean_s(flat @ Wp + bp) @ W1 + b1 == mean_patches @ (Wp @ W1) + (bp @ W1 + b1)
    w_bot = p["wp"] @ p["w1"]                                     # (P, F1)
    b_bot = p["bp"] @ p["w1"] + p["b1"]                           # (1, F1)
    # fold BatchNorm1d(eval) into the fused affine
    scale = p["bn_g"] * jax.lax.rsqrt(p["bn_var"] + BN_EPS)       # (1, F1)
    w_bot = w_bot * scale
    b_bot = (b_bot - p["bn_mu"]) * scale + p["bn_b"]

    # Fold patchify permutation + mean over S tokens into the weight:
    #   pixel (c, i, j) of the NCHW image maps to patch-dim
    #   pdim = c*PS*PS + (i%PS)*PS + (j%PS), contributing w_bot[pdim]/S.
    w_bot_r = w_bot.reshape(C, PS, PS, F1)
    w_eff = jnp.broadcast_to(
        w_bot_r[:, None, :, None, :, :],
        (C, H // PS, PS, W // PS, PS, F1)) / S
    w_eff = w_eff.reshape(CHW, F1)                                # (CHW, F1)

    def pad2(w, rows, cols):
        return jnp.zeros((rows, cols), jnp.float32).at[:w.shape[0], :w.shape[1]].set(w)

    # zero-padding keeps the math exact: padded bias cols are 0, ReLU(0)=0,
    # and the matching weight rows/cols are 0, so padding never leaks.
    w_pack = jnp.stack([pad2(p["w2"], LP, LP),
                        pad2(p["w3"], LP, LP),
                        pad2(p["w4"], LP, LP)])                   # (3, LP, LP)
    b_pack = jnp.stack([pad2(b_bot, 1, LP)[0],
                        pad2(p["b2"], 1, LP)[0],
                        pad2(p["b3"], 1, LP)[0],
                        pad2(p["b4"], 1, LP)[0]])                 # (4, LP) f32
    return {"w_eff": w_eff.astype(jnp.bfloat16),
            "w_pack": w_pack.astype(jnp.bfloat16),
            "b_pack": b_pack}


# ------------------------- pure-JAX references --------------------------------
def reference_forward(x, p):
    """Unfused f32 reference (semantic gold, eval-mode PyTorch head)."""
    xb = x.reshape(B, C, H // PS, PS, W // PS, PS)
    patches = xb.transpose(0, 2, 4, 1, 3, 5).reshape(B, S, P)
    hidden = patches.reshape(B * S, P) @ p["wp"] + p["bp"]
    feats = jnp.mean(hidden.reshape(B, S, D), axis=1)
    z1 = feats @ p["w1"] + p["b1"]
    z1 = (z1 - p["bn_mu"]) * jax.lax.rsqrt(p["bn_var"] + BN_EPS) * p["bn_g"] + p["bn_b"]
    h1 = jnp.maximum(z1, 0.0)
    h2 = jnp.maximum(h1 @ p["w2"] + p["b2"], 0.0)
    h3 = jnp.maximum(h2 @ p["w3"] + p["b3"], 0.0)
    return h3 @ p["w4"] + p["b4"]


def reference_fused(x, fused):
    """Mirror of the kernel math (same bf16 casts / f32 accumulation)."""
    xf = x.reshape(B, CHW).astype(jnp.bfloat16)
    b = fused["b_pack"]
    h1 = jnp.maximum(
        jnp.dot(xf, fused["w_eff"], preferred_element_type=jnp.float32) + b[0:1], 0.0)
    h2 = jnp.maximum(
        jnp.dot(h1.astype(jnp.bfloat16), fused["w_pack"][0],
                preferred_element_type=jnp.float32) + b[1:2], 0.0)
    h3 = jnp.maximum(
        jnp.dot(h2.astype(jnp.bfloat16), fused["w_pack"][1],
                preferred_element_type=jnp.float32) + b[2:3], 0.0)
    out = jnp.dot(h3.astype(jnp.bfloat16), fused["w_pack"][2],
                  preferred_element_type=jnp.float32) + b[3:4]
    return out[:, :NC]


if __name__ == "__main__":
    key = jax.random.PRNGKey(0)
    kx, kp = jax.random.split(key)
    x = jax.random.normal(kx, (B, C, H, W), jnp.float32)
    params = init_params(kp)
    fused = fuse_params(params)

    out = net_forward(x, fused)
    out = jax.block_until_ready(out)
    assert out.shape == (B, NC) and out.dtype == jnp.float32

    # tight check vs a JAX mirror of the exact fused/bf16 kernel math
    ref_fused = jax.block_until_ready(reference_fused(x, fused))
    assert jnp.allclose(out, ref_fused, rtol=1e-4, atol=1e-4), (
        f"max abs err vs fused ref {jnp.max(jnp.abs(out - ref_fused))}")

    # loose check vs the unfused f32 reference (bf16 weight rounding only)
    ref = jax.block_until_ready(reference_forward(x, params))
    assert jnp.allclose(out, ref, rtol=1e-2, atol=1e-2), (
        f"max abs err vs f32 ref {jnp.max(jnp.abs(out - ref))}")

    print("KERNEL_OK")
</pallas_src>

<mosaic_0001>
module attributes {stable_mosaic.version = 11 : i64} {
  func.func @net_head_kernel(%arg0: memref<2x1024xf32, #tpu.memory_space<vmem>>, %arg1: memref<1024x128xbf16, #tpu.memory_space<vmem>>, %arg2: memref<3x128x128xbf16, #tpu.memory_space<vmem>>, %arg3: memref<4x128xf32, #tpu.memory_space<vmem>>, %arg4: memref<2x128xf32, #tpu.memory_space<vmem>>) attributes {dimension_semantics = [], scalar_prefetch = 0 : i64, scratch_operands = 0 : i64, tpu.core_type = #tpu.core_type<tc>} {
    %c0 = arith.constant 0 : index
    %c0_0 = arith.constant 0 : index
    %0 = vector.load %arg0[%c0, %c0_0] : memref<2x1024xf32, #tpu.memory_space<vmem>>, vector<2x1024xf32>
    %1 = arith.truncf %0 : vector<2x1024xf32> to vector<2x1024xbf16>
    %c0_1 = arith.constant 0 : index
    %c0_2 = arith.constant 0 : index
    %2 = vector.load %arg3[%c0_1, %c0_2] : memref<4x128xf32, #tpu.memory_space<vmem>>, vector<4x128xf32>
    %c0_3 = arith.constant 0 : index
    %c0_4 = arith.constant 0 : index
    %3 = vector.load %arg1[%c0_3, %c0_4] : memref<1024x128xbf16, #tpu.memory_space<vmem>>, vector<1024x128xbf16>
    %cst = arith.constant dense<0.000000e+00> : vector<2x128xf32>
    %4 = tpu.matmul %1, %3, %cst {dimension_numbers = #tpu.dot_dimension_numbers<[1], [0], [0], [1], [0, 0, 1, 1], [], []>} : vector<2x1024xbf16>, vector<1024x128xbf16>, vector<2x128xf32> -> vector<2x128xf32>
    %5 = vector.extract_strided_slice %2 {offsets = [0, 0], sizes = [1, 128], strides = [1, 1]} : vector<4x128xf32> to vector<1x128xf32>
    %6 = vector.broadcast %5 : vector<1x128xf32> to vector<2x128xf32>
    %7 = arith.addf %4, %6 : vector<2x128xf32>
    %cst_5 = arith.constant 0.000000e+00 : f32
    %8 = vector.broadcast %cst_5 : f32 to vector<2x128xf32>
    %9 = arith.maximumf %7, %8 : vector<2x128xf32>
    %10 = arith.truncf %9 : vector<2x128xf32> to vector<2x128xbf16>
    %c0_6 = arith.constant 0 : index
    %c0_7 = arith.constant 0 : index
    %c0_8 = arith.constant 0 : index
    %11 = vector.load %arg2[%c0_6, %c0_7, %c0_8] : memref<3x128x128xbf16, #tpu.memory_space<vmem>>, vector<1x128x128xbf16>
    %12 = vector.shape_cast %11 : vector<1x128x128xbf16> to vector<128x128xbf16>
    %cst_9 = arith.constant dense<0.000000e+00> : vector<2x128xf32>
    %13 = tpu.matmul %10, %12, %cst_9 {dimension_numbers = #tpu.dot_dimension_numbers<[1], [0], [0], [1], [0, 0, 1, 1], [], []>} : vector<2x128xbf16>, vector<128x128xbf16>, vector<2x128xf32> -> vector<2x128xf32>
    %14 = vector.extract_strided_slice %2 {offsets = [1, 0], sizes = [1, 128], strides = [1, 1]} : vector<4x128xf32> to vector<1x128xf32>
    %15 = vector.broadcast %14 : vector<1x128xf32> to vector<2x128xf32>
    %16 = arith.addf %13, %15 : vector<2x128xf32>
    %cst_10 = arith.constant 0.000000e+00 : f32
    %17 = vector.broadcast %cst_10 : f32 to vector<2x128xf32>
    %18 = arith.maximumf %16, %17 : vector<2x128xf32>
    %19 = arith.truncf %18 : vector<2x128xf32> to vector<2x128xbf16>
    %c1 = arith.constant 1 : index
    %c0_11 = arith.constant 0 : index
    %c0_12 = arith.constant 0 : index
    %20 = vector.load %arg2[%c1, %c0_11, %c0_12] : memref<3x128x128xbf16, #tpu.memory_space<vmem>>, vector<1x128x128xbf16>
    %21 = vector.shape_cast %20 : vector<1x128x128xbf16> to vector<128x128xbf16>
    %cst_13 = arith.constant dense<0.000000e+00> : vector<2x128xf32>
    %22 = tpu.matmul %19, %21, %cst_13 {dimension_numbers = #tpu.dot_dimension_numbers<[1], [0], [0], [1], [0, 0, 1, 1], [], []>} : vector<2x128xbf16>, vector<128x128xbf16>, vector<2x128xf32> -> vector<2x128xf32>
    %23 = vector.extract_strided_slice %2 {offsets = [2, 0], sizes = [1, 128], strides = [1, 1]} : vector<4x128xf32> to vector<1x128xf32>
    %24 = vector.broadcast %23 : vector<1x128xf32> to vector<2x128xf32>
    %25 = arith.addf %22, %24 : vector<2x128xf32>
    %cst_14 = arith.constant 0.000000e+00 : f32
    %26 = vector.broadcast %cst_14 : f32 to vector<2x128xf32>
    %27 = arith.maximumf %25, %26 : vector<2x128xf32>
    %28 = arith.truncf %27 : vector<2x128xf32> to vector<2x128xbf16>
    %c2 = arith.constant 2 : index
    %c0_15 = arith.constant 0 : index
    %c0_16 = arith.constant 0 : index
    %29 = vector.load %arg2[%c2, %c0_15, %c0_16] : memref<3x128x128xbf16, #tpu.memory_space<vmem>>, vector<1x128x128xbf16>
    %30 = vector.shape_cast %29 : vector<1x128x128xbf16> to vector<128x128xbf16>
    %cst_17 = arith.constant dense<0.000000e+00> : vector<2x128xf32>
    %31 = tpu.matmul %28, %30, %cst_17 {dimension_numbers = #tpu.dot_dimension_numbers<[1], [0], [0], [1], [0, 0, 1, 1], [], []>} : vector<2x128xbf16>, vector<128x128xbf16>, vector<2x128xf32> -> vector<2x128xf32>
    %32 = vector.extract_strided_slice %2 {offsets = [3, 0], sizes = [1, 128], strides = [1, 1]} : vector<4x128xf32> to vector<1x128xf32>
    %33 = vector.broadcast %32 : vector<1x128xf32> to vector<2x128xf32>
    %34 = arith.addf %31, %33 : vector<2x128xf32>
    %c0_18 = arith.constant 0 : index
    %c0_19 = arith.constant 0 : index
    %35 = vector.load %arg4[%c0_18, %c0_19] : memref<2x128xf32, #tpu.memory_space<vmem>>, vector<2x128xf32>
    tpu.vector_store %arg4[%c0_18, %c0_19], %34 {strides = array<i32>} : memref<2x128xf32, #tpu.memory_space<vmem>>, vector<2x128xf32>,
    return
  }
}

</mosaic_0001>

<bundles_post_ra>
// kernel: net_forward.1
= control target key start
LH: loop header
LB: loop body
LE: loop exit
PB: predicated region body
PF: predicated region fallthrough
CT: control target
= control target key end

     0   :  { %9 = vsyncpa [#allocation3], 0  ;;  %s1654_s0 = inlined_call_operand.vmem [shape: f32[2,1024], index: 0, kind: input, shape index: {}]   ;;  %s1655_s1 = inlined_call_operand.hbm [shape: bf16[1024,128], index: 1, kind: input, shape index: {}]   ;;  %s1656_s2 = inlined_call_operand.hbm [shape: bf16[3,128,128], index: 2, kind: input, shape index: {}]   ;;  %s1657_s3 = inlined_call_operand.vmem [shape: f32[4,128], index: 3, kind: input, shape index: {}]   ;;  %s1658_s4 = inlined_call_operand.hbm [shape: f32[2,128], index: 4, kind: output, shape index: {}]  }
   0x1   :  { %10 = vsyncpa [#allocation6], 0 }
   0x2   :  { %11 = vsyncpa [#allocation4], 0  ;;  %s1554_s15 = smov [#allocation2]  }
   0x3   :  { %s19_s16 = sshll.u32 %s1554_s15, 4  ;;  %s20_s16 = int_to_ptr.vmem [resolvable:$true] %s19_s16 }
   0x4   :  { %s1496_s17 = scalar_lea.vmem %s20_s16, 8192  ;;  %p1501_p1 = scmp.lt.s32.totalorder %s20_s16, %s20_s16 }
   0x5   :  { %p1497_p0 = scmp.ne.s32.totalorder %s20_s16, %s1496_s17  ;;  %p1502_p2 = scmp.lt.s32.totalorder %s1496_s17, %s1496_s17 }
   0x7   :  { %p1503_p3 = por %p1502_p2, %p1501_p1 }
   0x9   :  { %p1504_p4 = pnand %p1503_p3, %p1497_p0 }
   0xb   :  { %1507 = shalt.err (!%p1504_p4)
}
   0xc   :  { %s1555_s18 = smov 64   ;;  %s1556_s19 = smov 4  }
   0xd   :  { %25 = dma.hbm_to_vmem [thread:$0]  %s1655_s1, 8192, %s20_s16, [#allocation3], %s1555_s18, %s1555_s18, %s1556_s19  }
   0xe   :  { %s1557_s22 = smov [#allocation5]  }
   0xf   :  { %s31_s23 = sshll.u32 %s1557_s22, 4  ;;  %s32_s23 = int_to_ptr.vmem [resolvable:$true] %s31_s23 }
  0x10   :  { %s1516_s24 = scalar_lea.vmem %s32_s23, 3072  ;;  %p1521_p6 = scmp.lt.s32.totalorder %s32_s23, %s32_s23 }
  0x11   :  { %p1517_p5 = scmp.ne.s32.totalorder %s32_s23, %s1516_s24  ;;  %p1522_p7 = scmp.lt.s32.totalorder %s1516_s24, %s1516_s24 }
  0x13   :  { %p1523_p8 = por %p1522_p7, %p1521_p6 }
  0x15   :  { %p1524_p9 = pnand %p1523_p8, %p1517_p5 }
  0x17   :  { %1527 = shalt.err (!%p1524_p9)
}
  0x18   :  { %37 = dma.hbm_to_vmem [thread:$0]  %s1656_s2, 3072, %s32_s23, [#allocation6], %s1555_s18, %s1555_s18, %s1556_s19  }
  0x19   :  { %1548 = dma.done.wait [#allocation3], 8192  }
  0x1a   :  { %1549 = vsyncadd [#allocation3], 4294959104 }
  0x1b   :  { %1550 = dma.done.wait [#allocation6], 3072  }
  0x1c   :  { %1551 = vsyncadd [#allocation6], 4294964224  ;;  %v1398_v0 = vld [vmem:[#allocation2 + $0x78] sm:$0xff]   ;;  %v1402_v4 = vld [vmem:[#allocation2 + $0x70] sm:$0xff]   ;;  %v1558_v22 = vmov 1983009808   ;;  %v55_v24 = vlaneseq }
  0x1d   :  { %v1399_v1 = vld [vmem:[#allocation2 + $0xf8] sm:$0xff]   ;;  %1215 = vmatprep.subr.bf16.mxu0 %v1398_v0  ;;  %v1403_v5 = vld [vmem:[#allocation2 + $0xf0] sm:$0xff]   ;;  %v1406_v8 = vld [vmem:[#allocation2 + $0x68] sm:$0xff]   ;;  %v53_v23 = vunpack.c.l.s4 %v1558_v22  ;;  %vm1560_vm0 = vmmov 0  }
  0x1e   :  { %v1400_v2 = vld [vmem:[#allocation2 + $0x38] sm:$0xff]   ;;  %1237 = vmatprep.subr.bf16.mxu1 %v1399_v1  ;;  %v1404_v6 = vld [vmem:[#allocation2 + $0x30] sm:$0xff]   ;;  %v1407_v9 = vld [vmem:[#allocation2 + $0xe8] sm:$0xff]   ;;  %v1593_v30 = vshrl.u32 %v55_v24, 7 }
  0x1f   :  { %v1401_v3 = vld [vmem:[#allocation2 + $0xb8] sm:$0xff]   ;;  %1216 = vmatpush3.bf16.msra.mxu0 %v1400_v2  ;;  %v1405_v7 = vld [vmem:[#allocation2 + $0xb0] sm:$0xff]   ;;  %v1408_v10 = vld [vmem:[#allocation2 + $0x28] sm:$0xff]   ;;  %v54_v29 = vunpack.c.0.s8 %v53_v23 }
  0x20   :  { %1238 = vmatpush3.bf16.msra.mxu1 %v1401_v3  ;;  %1217 = vmatprep.subr.bf16.mxu0 %v1402_v4  ;;  %v1409_v11 = vld [vmem:[#allocation2 + $0xa8] sm:$0xff]   ;;  %v1410_v12 = vld [vmem:[#allocation2 + $0x60] sm:$0xff]   ;;  %v1414_v16 = vld [vmem:[#allocation2 + $0x58] sm:$0xff]  }
  0x21   :  { %1239 = vmatprep.subr.bf16.mxu1 %v1403_v5  ;;  %v1411_v13 = vld [vmem:[#allocation2 + $0xe0] sm:$0xff]   ;;  %v1415_v17 = vld [vmem:[#allocation2 + $0xd8] sm:$0xff]   ;;  %v1418_v20 = vld [vmem:[#allocation2 + $0x50] sm:$0xff]   ;;  %v1596_v35 = vsub.s32 %v54_v29, %v1593_v30 }
  0x22   :  { %v1412_v14 = vld [vmem:[#allocation2 + $0x20] sm:$0xff]   ;;  %v1416_v18 = vld [vmem:[#allocation2 + $0x18] sm:$0xff]   ;;  %v1419_v21 = vld [vmem:[#allocation2 + $0xd0] sm:$0xff]  }
  0x23   :  { %1218 = vmatpush3.bf16.msra.mxu0 %v1404_v6  ;;  %v1413_v15 = vld [vmem:[#allocation2 + $0xa0] sm:$0xff]   ;;  %v1417_v19 = vld [vmem:[#allocation2 + $0x98] sm:$0xff]   ;;  %v1420_v25 = vld [vmem:[#allocation2 + $0x10] sm:$0xff]  }
  0x24   :  { %1240 = vmatpush3.bf16.msra.mxu1 %v1405_v7  ;;  %1219 = vmatprep.subr.bf16.mxu0 %v1406_v8  ;;  %v1421_v26 = vld [vmem:[#allocation2 + $0x90] sm:$0xff]   ;;  %v1422_v27 = vld [vmem:[#allocation2 + $0x48] sm:$0xff]   ;;  %v1426_v33 = vld [vmem:[#allocation2 + $0x40] sm:$0xff]  }
  0x25   :  { %1241 = vmatprep.subr.bf16.mxu1 %v1407_v9  ;;  %v1423_v28 = vld [vmem:[#allocation2 + $0xc8] sm:$0xff]   ;;  %v1427_v34 = vld [vmem:[#allocation2 + $0xc0] sm:$0xff]   ;;  %v1431_v41 = vld [vmem:[#allocation2 + $0x178] sm:$0xff]  }
  0x26   :  { %v1424_v31 = vld [vmem:[#allocation2 + $0x8] sm:$0xff]   ;;  %v1428_v36 = vld [vmem:[#allocation2] sm:$0xff]   ;;  %v1432_v42 = vld [vmem:[#allocation2 + $0x1f8] sm:$0xff]  }
  0x27   :  { %1220 = vmatpush3.bf16.msra.mxu0 %v1408_v10  ;;  %v1425_v32 = vld [vmem:[#allocation2 + $0x88] sm:$0xff]   ;;  %v1429_v37 = vld [vmem:[#allocation2 + $0x80] sm:$0xff]   ;;  %v1433_v46 = vld [vmem:[#allocation2 + $0x138] sm:$0xff]  }
  0x28   :  { %1242 = vmatpush3.bf16.msra.mxu1 %v1409_v11  ;;  %1221 = vmatprep.subr.bf16.mxu0 %v1410_v12  ;;  %v47_v38 = vld [vmem:[%s1654_s0] sm:$0xff]  ;;  %v1434_v49 = vld [vmem:[#allocation2 + $0x1b8] sm:$0xff]   ;;  %v1435_v51 = vld [vmem:[#allocation2 + $0x170] sm:$0xff]  }
  0x29   :  { %1243 = vmatprep.subr.bf16.mxu1 %v1411_v13  ;;  %v58_v39 = vrot.slane %v47_v38, %v1596_v35  ;;  %v51_v40 = vcombine.high %v47_v38, %v47_v38  ;;  %v1436_v53 = vld [vmem:[#allocation2 + $0x1f0] sm:$0xff]   ;;  %v1439_v56 = vld [vmem:[#allocation2 + $0x168] sm:$0xff]   ;;  %v1443_v60 = vld [vmem:[#allocation2 + $0x160] sm:$0xff]  }
  0x2a   :  { %v1437_v54 = vld [vmem:[#allocation2 + $0x130] sm:$0xff]   ;;  %v1440_v57 = vld [vmem:[#allocation2 + $0x1e8] sm:$0xff]   ;;  %v1444_v61 = vld [vmem:[#allocation2 + $0x1e0] sm:$0xff]  }
  0x2b   :  { %1222 = vmatpush3.bf16.msra.mxu0 %v1412_v14  ;;  %v66_v43 = vcombine.high %v58_v39, %v58_v39  ;;  %v65_v44 = vrot.slane %v51_v40, %v1596_v35  ;;  %v93_v45 = vpack.c.bf16 %v58_v39, %v58_v39  ;;  %v1438_v55 = vld [vmem:[#allocation2 + $0x1b0] sm:$0xff]   ;;  %v1441_v58 = vld [vmem:[#allocation2 + $0x128] sm:$0xff]   ;;  %v1445_v62 = vld [vmem:[#allocation2 + $0x120] sm:$0xff]  }
  0x2c   :  { %1244 = vmatpush3.bf16.msra.mxu1 %v1413_v15  ;;  %1223 = vmatprep.subr.bf16.mxu0 %v1414_v16  ;;  %v1442_v59 = vld [vmem:[#allocation2 + $0x1a8] sm:$0xff]   ;;  %v1446_v63 = vld [vmem:[#allocation2 + $0x1a0] sm:$0xff]   ;;  %v1447_v0 = vld [vmem:[#allocation2 + $0x158] sm:$0xff]  }
  0x2d   :  { %1245 = vmatprep.subr.bf16.mxu1 %v1415_v17  ;;  %v94_v47 = vpack.c.bf16 %v66_v43, %v66_v43  ;;  %v67_v48 = vcombine.high %v65_v44, %v65_v44  ;;  %v95_v50 = vpack.c.bf16 %v65_v44, %v65_v44  ;;  %v1448_v1 = vld [vmem:[#allocation2 + $0x1d8] sm:$0xff]   ;;  %v1451_v4 = vld [vmem:[#allocation2 + $0x150] sm:$0xff]   ;;  %v1455_v8 = vld [vmem:[#allocation2 + $0x148] sm:$0xff]  }
  0x2e   :  { %v1449_v2 = vld [vmem:[#allocation2 + $0x118] sm:$0xff]   ;;  %v1452_v5 = vld [vmem:[#allocation2 + $0x1d0] sm:$0xff]   ;;  %v1456_v9 = vld [vmem:[#allocation2 + $0x1c8] sm:$0xff]  }
  0x2f   :  { %1224 = vmatpush3.bf16.msra.mxu0 %v1416_v18  ;;  %650 = vmatprep.mubr.bf16.mxu0 %v94_v47  ;;  %v96_v52 = vpack.c.bf16 %v67_v48, %v67_v48  ;;  %v1450_v3 = vld [vmem:[#allocation2 + $0x198] sm:$0xff]   ;;  %v1453_v6 = vld [vmem:[#allocation2 + $0x110] sm:$0xff]   ;;  %v1457_v10 = vld [vmem:[#allocation2 + $0x108] sm:$0xff]  }
  0x30   :  { %1246 = vmatpush3.bf16.msra.mxu1 %v1417_v19  ;;  %1225 = vmatprep.subr.bf16.mxu0 %v1418_v20  ;;  %v1454_v7 = vld [vmem:[#allocation2 + $0x190] sm:$0xff]   ;;  %v1458_v11 = vld [vmem:[#allocation2 + $0x188] sm:$0xff]   ;;  %v1459_v12 = vld [vmem:[#allocation2 + $0x140] sm:$0xff]  }
  0x31   :  { %1247 = vmatprep.subr.bf16.mxu1 %v1419_v21  ;;  %690 = vmatprep.mubr.bf16.mxu1 %v96_v52  ;;  %v1460_v13 = vld [vmem:[#allocation2 + $0x1c0] sm:$0xff]   ;;  %v48_v15 = vld [vmem:[%s1654_s0 + $0x8] sm:$0xff]  ;;  %v1476_v40 = vld [vmem:[#allocation5 + $0x58] sm:$0xff]  }
  0x32   :  { %v1461_v14 = vld [vmem:[#allocation2 + $0x100] sm:$0xff]   ;;  %v75_v17 = vrot.slane %v48_v15, %v1596_v35  ;;  %v68_v18 = vcombine.high %v48_v15, %v48_v15  ;;  %v1466_v29 = vld [vmem:[#allocation5 + $0x28] sm:$0xff]   ;;  %v798_v15 = vsub.s32 1, %v1593_v30 }
  0x33   :  { %1226 = vmatpush3.bf16.msra.mxu0 %v1420_v25  ;;  %v1462_v16 = vld [vmem:[#allocation2 + $0x180] sm:$0xff]   ;;  %v1474_v38 = vld [vmem:[#allocation5 + $0x68] sm:$0xff]  }
  0x34   :  { %1248 = vmatpush3.bf16.msra.mxu1 %v1421_v26  ;;  %1227 = vmatprep.subr.bf16.mxu0 %v1422_v27  ;;  %v83_v19 = vcombine.high %v75_v17, %v75_v17  ;;  %v82_v20 = vrot.slane %v68_v18, %v1596_v35  ;;  %v97_v21 = vpack.c.bf16 %v75_v17, %v75_v17  ;;  %v1464_v26 = vld [vmem:[#allocation5 + $0x38] sm:$0xff]   ;;  %v1559_v27 = vmov 0.0   ;;  %v1471_v35 = vld [vmem:[#allocation5] sm:$0xff]  }
  0x35   :  { %1249 = vmatprep.subr.bf16.mxu1 %v1423_v28  ;;  %v1465_v28 = vld [vmem:[#allocation5 + $0x30] sm:$0xff]   ;;  %v1475_v39 = vld [vmem:[#allocation5 + $0x60] sm:$0xff]  }
  0x36   :  { %v98_v22 = vpack.c.bf16 %v83_v19, %v83_v19  ;;  %v84_v23 = vcombine.high %v82_v20, %v82_v20  ;;  %v99_v24 = vpack.c.bf16 %v82_v20, %v82_v20 }
  0x37   :  { %1228 = vmatpush3.bf16.msra.mxu0 %v1424_v31  ;;  %v1467_v31 = vld [vmem:[#allocation5 + $0x20] sm:$0xff]  }
  0x38   :  { %1250 = vmatpush3.bf16.msra.mxu1 %v1425_v32  ;;  %1229 = vmatprep.subr.bf16.mxu0 %v1426_v33  ;;  %v100_v25 = vpack.c.bf16 %v84_v23, %v84_v23  ;;  %v1468_v32 = vld [vmem:[#allocation5 + $0x18] sm:$0xff]   ;;  %v1469_v33 = vld [vmem:[#allocation5 + $0x10] sm:$0xff]  }
  0x39   :  { %1251 = vmatprep.subr.bf16.mxu1 %v1427_v34  ;;  %v1470_v34 = vld [vmem:[#allocation5 + $0x8] sm:$0xff]  }
  0x3b   :  { %1230 = vmatpush3.bf16.msra.mxu0 %v1428_v36  ;;  %v1472_v36 = vld [vmem:[#allocation5 + $0x78] sm:$0xff]  }
  0x3c   :  { %1252 = vmatpush3.bf16.msra.mxu1 %v1429_v37  ;;  %1259 = vmatprep.subr.bf16.mxu0 %v1431_v41  ;;  %v1473_v37 = vld [vmem:[#allocation5 + $0x70] sm:$0xff]  }
  0x3d   :  { %1281 = vmatprep.subr.bf16.mxu1 %v1432_v42  ;;  %v1477_v41 = vld [vmem:[#allocation5 + $0x50] sm:$0xff]  }
  0x3e   :  { %651 = vmatmul.mubr.bf16.vlgmr.msra.gmra.mxu0 %v93_v45 }
  0x3f   :  { %1260 = vmatpush3.bf16.msra.mxu0 %v1433_v46  ;;  %691 = vmatmul.mubr.bf16.vlgmr.msra.gmra.mxu1 %v95_v50  ;;  %v232_v50 = vsub.s32 0, %v1593_v30 }
  0x40   :  { %1261 = vmatprep.subr.bf16.mxu0 %v1435_v51  ;;  %1282 = vmatpush3.bf16.msra.mxu1 %v1434_v49  ;;  %v1632_v51 = vld [vmem:[%s1657_s3] sm:$0xf]  ;;  %s1561_s3 = smov [#allocation7]  }
  0x41   :  { %1283 = vmatprep.subr.bf16.mxu1 %v1436_v53  ;;  %730 = vmatprep.mubr.bf16.mxu0 %v98_v22  ;;  %v233_v52 = vrot.slane %v1632_v51, %v232_v50  ;;  %s1117_s30 = sshll.u32 %s1561_s3, 4  ;;  %s1118_s30 = int_to_ptr.vmem [resolvable:$true] %s1117_s30 }
  0x42   :  { %770 = vmatprep.mubr.bf16.mxu1 %v100_v25  ;;  %v1487_v25 = vld [vmem:[#allocation5 + $0x80] sm:$0xff]   ;;  %s1528_s5 = scalar_lea.vmem %s1118_s30, 32  ;;  %p1533_p11 = scmp.lt.s32.totalorder %s1118_s30, %s1118_s30 }
  0x43   :  { %1262 = vmatpush3.bf16.msra.mxu0 %v1437_v54  ;;  %p1529_p10 = scmp.ne.s32.totalorder %s1118_s30, %s1528_s5  ;;  %p1534_p12 = scmp.lt.s32.totalorder %s1528_s5, %s1528_s5 }
  0x44   :  { %1263 = vmatprep.subr.bf16.mxu0 %v1439_v56  ;;  %1284 = vmatpush3.bf16.msra.mxu1 %v1438_v55 }
  0x45   :  { %1285 = vmatprep.subr.bf16.mxu1 %v1440_v57  ;;  %p1535_p13 = por %p1534_p12, %p1533_p11 }
  0x47   :  { %1264 = vmatpush3.bf16.msra.mxu0 %v1441_v58  ;;  %p1536_p0 = pnand %p1535_p13, %p1529_p10 }
  0x48   :  { %1265 = vmatprep.subr.bf16.mxu0 %v1443_v60  ;;  %1286 = vmatpush3.bf16.msra.mxu1 %v1442_v59 }
  0x49   :  { %1287 = vmatprep.subr.bf16.mxu1 %v1444_v61 }
  0x4b   :  { %1266 = vmatpush3.bf16.msra.mxu0 %v1445_v62 }
  0x4c   :  { %1267 = vmatprep.subr.bf16.mxu0 %v1447_v0  ;;  %1288 = vmatpush3.bf16.msra.mxu1 %v1446_v63 }
  0x4d   :  { %1289 = vmatprep.subr.bf16.mxu1 %v1448_v1 }
  0x4f   :  { %1268 = vmatpush3.bf16.msra.mxu0 %v1449_v2 }
  0x50   :  { %1269 = vmatprep.subr.bf16.mxu0 %v1451_v4  ;;  %1290 = vmatpush3.bf16.msra.mxu1 %v1450_v3 }
  0x51   :  { %1291 = vmatprep.subr.bf16.mxu1 %v1452_v5 }
  0x53   :  { %1270 = vmatpush3.bf16.msra.mxu0 %v1453_v6 }
  0x54   :  { %1271 = vmatprep.subr.bf16.mxu0 %v1455_v8  ;;  %1292 = vmatpush3.bf16.msra.mxu1 %v1454_v7  ;;  %v1478_v7 = vld [vmem:[#allocation5 + $0x48] sm:$0xff]   ;;  %v1479_v8 = vld [vmem:[#allocation5 + $0x40] sm:$0xff]  }
  0x55   :  { %1293 = vmatprep.subr.bf16.mxu1 %v1456_v9  ;;  %v1480_v9 = vld [vmem:[#allocation5 + $0xb8] sm:$0xff]  }
  0x57   :  { %1272 = vmatpush3.bf16.msra.mxu0 %v1457_v10  ;;  %v1481_v10 = vld [vmem:[#allocation5 + $0xb0] sm:$0xff]  }
  0x58   :  { %1273 = vmatprep.subr.bf16.mxu0 %v1459_v12  ;;  %1294 = vmatpush3.bf16.msra.mxu1 %v1458_v11  ;;  %v1482_v11 = vld [vmem:[#allocation5 + $0xa8] sm:$0xff]   ;;  %v1483_v12 = vld [vmem:[#allocation5 + $0xa0] sm:$0xff]  }
  0x59   :  { %1295 = vmatprep.subr.bf16.mxu1 %v1460_v13  ;;  %v1484_v13 = vld [vmem:[#allocation5 + $0x98] sm:$0xff]  }
  0x5b   :  { %1274 = vmatpush3.bf16.msra.mxu0 %v1461_v14  ;;  %v1485_v14 = vld [vmem:[#allocation5 + $0x90] sm:$0xff]  }
  0x5c   :  { %1296 = vmatpush3.bf16.msra.mxu1 %v1462_v16  ;;  %1330 = vmatprep.subr.bf16.mxu0 %v1559_v27  ;;  %v799_v16 = vrot.slane %v1632_v51, %v798_v15 }
  0x5d   :  { %1350 = vmatprep.subr.bf16.mxu1 %v1559_v27 }
  0x5e   :  { %731 = vmatmul.mubr.bf16.vlgmr.msra.gmra.mxu0 %v97_v21 }
  0x5f   :  { %771 = vmatmul.mubr.bf16.vlgmr.msra.gmra.mxu1 %v99_v24  ;;  %1331 = vmatpush3.bf16.msra.mxu0 %v1464_v26  ;;  %v1486_v24 = vld [vmem:[#allocation5 + $0x88] sm:$0xff]   ;;  %v909_v26 = vsub.s32 2, %v1593_v30 }
  0x60   :  { %1332 = vmatprep.subr.bf16.mxu0 %v1559_v27  ;;  %1346 = vmatprep.mubr.msk.bf16.mxu0 %vm1560_vm0, %v1559_v27 }
  0x61   :  { %1366 = vmatprep.mubr.msk.bf16.mxu1 %vm1560_vm0, %v1559_v27  ;;  %1351 = vmatpush3.bf16.msra.mxu1 %v1472_v36 }
  0x62   :  { %1352 = vmatprep.subr.bf16.mxu1 %v1559_v27 }
  0x63   :  { %1333 = vmatpush3.bf16.msra.mxu0 %v1465_v28  ;;  %v910_v28 = vrot.slane %v1632_v51, %v909_v26 }
  0x64   :  { %1334 = vmatprep.subr.bf16.mxu0 %v1559_v27 }
  0x65   :  { %1353 = vmatpush3.bf16.msra.mxu1 %v1473_v37  ;;  %v1020_v37 = vsub.s32 3, %v1593_v30 }
  0x66   :  { %1354 = vmatprep.subr.bf16.mxu1 %v1559_v27 }
  0x67   :  { %1335 = vmatpush3.bf16.msra.mxu0 %v1466_v29 }
  0x68   :  { %1336 = vmatprep.subr.bf16.mxu0 %v1559_v27 }
  0x69   :  { %1355 = vmatpush3.bf16.msra.mxu1 %v1474_v38  ;;  %v1021_v38 = vrot.slane %v1632_v51, %v1020_v37 }
  0x6a   :  { %1356 = vmatprep.subr.bf16.mxu1 %v1559_v27 }
  0x6b   :  { %1337 = vmatpush3.bf16.msra.mxu0 %v1467_v31 }
  0x6c   :  { %1338 = vmatprep.subr.bf16.mxu0 %v1559_v27 }
  0x6d   :  { %1357 = vmatpush3.bf16.msra.mxu1 %v1475_v39 }
  0x6e   :  { %1358 = vmatprep.subr.bf16.mxu1 %v1559_v27 }
  0x6f   :  { %1339 = vmatpush3.bf16.msra.mxu0 %v1468_v32 }
  0x70   :  { %1340 = vmatprep.subr.bf16.mxu0 %v1559_v27 }
  0x71   :  { %1359 = vmatpush3.bf16.msra.mxu1 %v1476_v40 }
  0x72   :  { %1360 = vmatprep.subr.bf16.mxu1 %v1559_v27 }
  0x73   :  { %1341 = vmatpush3.bf16.msra.mxu0 %v1469_v33 }
  0x74   :  { %1342 = vmatprep.subr.bf16.mxu0 %v1559_v27 }
  0x75   :  { %1361 = vmatpush3.bf16.msra.mxu1 %v1477_v41 }
  0x76   :  { %1362 = vmatprep.subr.bf16.mxu1 %v1559_v27 }
  0x77   :  { %1343 = vmatpush3.bf16.msra.mxu0 %v1470_v34 }
  0x78   :  { %1344 = vmatprep.subr.bf16.mxu0 %v1559_v27 }
  0x79   :  { %1363 = vmatpush3.bf16.msra.mxu1 %v1478_v7 }
  0x7a   :  { %1364 = vmatprep.subr.bf16.mxu1 %v1559_v27 }
  0x7b   :  { %1345 = vmatpush3.bf16.msra.mxu0 %v1471_v35 }
  0x7c   :  { %1370 = vmatprep.subr.bf16.mxu0 %v1559_v27 }
  0x7d   :  { %1365 = vmatpush3.bf16.msra.mxu1 %v1479_v8 }
  0xfe   :  { %v1231_v42 = vpop.f32.mrf.mxu0 }
  0xff   :  { %v1253_v43 = vpop.f32.mrf.mxu1 }
 0x100   :  { %v1232_v44 = vpop.f32.mrf.mxu0 }
 0x101   :  { %v1254_v45 = vpop.f32.mrf.mxu1  ;;  %v1233_v53 = vadd.f32 %v1232_v44, %v1231_v42 }
 0x102   :  { %v1234_v46 = vpop.f32.mrf.mxu0  ;;  %v1255_v55 = vadd.f32 %v1254_v45, %v1253_v43 }
 0x103   :  { %v1256_v47 = vpop.f32.mrf.mxu1  ;;  %v653_v54 = vadd.f32 %v1233_v53, %v233_v52 }
 0x104   :  { %v1235_v48 = vpop.f32.mrf.mxu0 }
 0x105   :  { %v1257_v49 = vpop.f32.mrf.mxu1  ;;  %v693_v59 = vadd.f32 %v1255_v55, %v653_v54 }
 0x11e   :  { %v1275_v56 = vpop.f32.mrf.mxu0 }
 0x11f   :  { %v1297_v57 = vpop.f32.mrf.mxu1 }
 0x120   :  { %v1276_v58 = vpop.f32.mrf.mxu0 }
 0x121   :  { %v1277_v60 = vadd.f32 %v1276_v58, %v1275_v56  ;;  %v1298_v61 = vpop.f32.mrf.mxu1 }
 0x122   :  { %v1278_v62 = vpop.f32.mrf.mxu0  ;;  %v1299_v0 = vadd.f32 %v1298_v61, %v1297_v57 }
 0x123   :  { %v733_v63 = vadd.f32 %v1277_v60, %v693_v59  ;;  %v1300_v1 = vpop.f32.mrf.mxu1 }
 0x124   :  { %v1279_v2 = vpop.f32.mrf.mxu0 }
 0x125   :  { %v773_v3 = vadd.f32 %v1299_v0, %v733_v63  ;;  %v1301_v4 = vpop.f32.mrf.mxu1 }
 0x127   :  { %v778_v5 = vmax.f32 %v773_v3, 0.0 }
 0x129   :  { %v779_v6 = vpack.c.bf16 %v778_v5, %v778_v5 }
 0x12b   :  { %1347 = vmatmul.mubr.bf16.vlgmr.msra.gmra.mxu0 %v779_v6 }
 0x12c   :  { %1386 = vmatprep.mubr.msk.bf16.mxu0 %vm1560_vm0, %v1559_v27  ;;  %1371 = vmatpush3.bf16.msra.mxu0 %v1480_v9 }
 0x12d   :  { %1372 = vmatprep.subr.bf16.mxu0 %v1559_v27 }
 0x130   :  { %1373 = vmatpush3.bf16.msra.mxu0 %v1481_v10 }
 0x131   :  { %1374 = vmatprep.subr.bf16.mxu0 %v1559_v27 }
 0x134   :  { %1375 = vmatpush3.bf16.msra.mxu0 %v1482_v11 }
 0x135   :  { %1376 = vmatprep.subr.bf16.mxu0 %v1559_v27 }
 0x138   :  { %1377 = vmatpush3.bf16.msra.mxu0 %v1483_v12 }
 0x139   :  { %1378 = vmatprep.subr.bf16.mxu0 %v1559_v27 }
 0x13c   :  { %1379 = vmatpush3.bf16.msra.mxu0 %v1484_v13 }
 0x13d   :  { %1380 = vmatprep.subr.bf16.mxu0 %v1559_v27 }
 0x140   :  { %1381 = vmatpush3.bf16.msra.mxu0 %v1485_v14 }
 0x141   :  { %1382 = vmatprep.subr.bf16.mxu0 %v1559_v27 }
 0x144   :  { %1383 = vmatpush3.bf16.msra.mxu0 %v1486_v24 }
 0x145   :  { %1384 = vmatprep.subr.bf16.mxu0 %v1559_v27 }
 0x148   :  { %1385 = vmatpush3.bf16.msra.mxu0 %v1487_v25 }
 0x1eb   :  { %v882_v17 = vpop.f32.mrf.mxu0 }
 0x1ec   :  { %v883_v18 = vadd.f32 %v882_v17, %v799_v16 }
 0x1ed   :  { %v1348_v19 = vpop.f32.mrf.mxu0 }
 0x1ee   :  { %v888_v20 = vmax.f32 %v883_v18, 0.0 }
 0x1ef   :  { %v885_v21 = vpop.f32.mrf.mxu0 }
 0x1f0   :  { %v889_v22 = vpack.c.bf16 %v888_v20, %v888_v20 }
 0x1f1   :  { %v1349_v23 = vpop.f32.mrf.mxu0 }
 0x1f2   :  { %1367 = vmatmul.mubr.bf16.vlgmr.msra.gmra.mxu1 %v889_v22 }
 0x2b2   :  { %v993_v29 = vpop.f32.mrf.mxu1 }
 0x2b3   :  { %v994_v31 = vadd.f32 %v993_v29, %v910_v28 }
 0x2b4   :  { %v1368_v32 = vpop.f32.mrf.mxu1 }
 0x2b5   :  { %v999_v33 = vmax.f32 %v994_v31, 0.0 }
 0x2b6   :  { %v996_v34 = vpop.f32.mrf.mxu1 }
 0x2b7   :  { %v1000_v35 = vpack.c.bf16 %v999_v33, %v999_v33 }
 0x2b8   :  { %v1369_v36 = vpop.f32.mrf.mxu1 }
 0x2b9   :  { %1387 = vmatmul.mubr.bf16.vlgmr.msra.gmra.mxu0 %v1000_v35 }
 0x379   :  { %v1104_v27 = vpop.f32.mrf.mxu0 }
 0x37a   :  { %v1105_v39 = vadd.f32 %v1104_v27, %v1021_v38 }
 0x37b   :  { %v1388_v40 = vpop.f32.mrf.mxu0 }
 0x37c   :  { %1110 = vst [vmem:[#allocation7] sm:$0x3] %v1105_v39 }
 0x37d   :  { %v1107_v41 = vpop.f32.mrf.mxu0 }
 0x37e   :  { %1539 = shalt.err (!%p1536_p0)
}
 0x37f   :  { %1120 = dma.vmem_to_hbm [thread:$0]  %s1118_s30, 32, %s1658_s4, [#allocation4]   ;;  %v1389_v30 = vpop.f32.mrf.mxu0 }
 0x380   :  { %1552 = dma.done.wait [#allocation4], 32  }
 0x381   :  { %1553 = vsyncadd [#allocation4], 4294967264 }
 0x382   :  { %1124 = vsyncpa [#allocation3], 1 }
 0x383   :  { %1125 = vsyncpa [#allocation6], 1 }
 0x384   :  { %1126 = vsyncpa [#allocation4], 1 }

</bundles_post_ra>
